<compile_context>
chip_gen: v6e
topology: v6e:2x2x1
jax: 0.10.0
libtpu: 0.0.40
codegen_flags: <defaults>
</compile_context>

<pallas_src>
import math
import functools

import jax
import jax.numpy as jnp
from jax import lax
from jax.experimental import pallas as pl
from jax.experimental.pallas import tpu as pltpu  # noqa: F401  (TPU backend)


# ----------------------------------------------------------------------------
# Fused kernel: QKV proj + heads-batched MHA + head concat + output proj
# (whole batch, single invocation, everything VMEM resident)
# ----------------------------------------------------------------------------
def _fused_mha_kernel(x_ref, wqkv_ref, bqkv_ref, wo_ref, bo_ref, o_ref, *,
                      seq_len, batch, num_heads, head_dim):
    L, B, H, dh = seq_len, batch, num_heads, head_dim
    E = H * dh
    G = H * B                               # flattened (head, batch) batch dim
    cdt = wqkv_ref.dtype                    # compute dtype for MXU inputs

    x = x_ref[...]                                                   # (L, B, E)
    # Batch-major activation rows (row index = b*L + l): B cheap sublane slices
    # + one sublane concat -> one tall (B*L, E) matmul for the MXU.
    x_rows = jnp.concatenate([x[:, b, :] for b in range(B)], axis=0)  # (B*L, E)

    # Fused QKV projection; Q weights/bias were pre-scaled by 1/sqrt(dh).
    qkv = jnp.dot(x_rows.astype(cdt), wqkv_ref[...],
                  preferred_element_type=jnp.float32) + bqkv_ref[...]  # (B*L,3E)

    # Gather per-head (B, L, dh) blocks and stack them on one leading batch dim
    # G = H*B.  Only column slices + leading-dim reshapes (minor dim untouched).
    def split_heads(base):
        parts = [qkv[:, base + h * dh: base + (h + 1) * dh].reshape(B, L, dh)
                 for h in range(H)]
        return jnp.concatenate(parts, axis=0)                         # (G, L, dh)

    q = split_heads(0)
    k = split_heads(E)
    v = split_heads(2 * E)

    # One batched MXU chain for all scores: (G, L, dh) x (G, L, dh) -> (G, L, L).
    scores = jnp.einsum("gld,gmd->glm", q.astype(cdt), k.astype(cdt),
                        preferred_element_type=jnp.float32)

    # Softmax over keys, batched across every (head, batch, query) row at once:
    # (G*L, L) so the row max / exp / row sum are a single pass.
    s2 = scores.reshape(G * L, L)
    m = jnp.max(s2, axis=-1, keepdims=True)
    e = jnp.exp(s2 - m)
    denom = jnp.sum(e, axis=-1, keepdims=True)
    p = e * pl.reciprocal(denom, approx=True)        # EUP slot, off the VPU path
    p = p.reshape(G, L, L)

    # One batched MXU chain for the context: (G, L, L) x (G, L, dh) -> (G, L, dh).
    ctx = jnp.einsum("glm,gmd->gld", p.astype(cdt), v.astype(cdt),
                     preferred_element_type=jnp.float32)

    # Concatenate heads back to (B*L, E) rows (lane-axis concat).
    ctx_rows = jnp.concatenate(
        [ctx[h * B:(h + 1) * B].reshape(B * L, dh) for h in range(H)], axis=-1)

    # Fused output projection.
    out_rows = jnp.dot(ctx_rows.astype(cdt), wo_ref[...],
                       preferred_element_type=jnp.float32) + bo_ref[...]  # (B*L,E)

    # Store back in the module's native (L, B, E) layout (no wrapper transpose).
    # TODO(synk): with E < 128 these stores are lane-masked; for production
    # sizes (E >= 128) they become dense automatically.
    for b in range(B):
        o_ref[:, b, :] = out_rows[b * L:(b + 1) * L, :]


# ----------------------------------------------------------------------------
# One-time parameter preparation (hoisted out of the forward path)
# ----------------------------------------------------------------------------
def prepare_attention_params(params, num_heads, compute_dtype=jnp.float32):
    """Pre-transpose / fuse / scale the nn.MultiheadAttention parameters.

    Call once at init; pass the result to attention_layer_forward.
    """
    w_in = params["in_proj_weight"]                   # (3E, E): [Wq; Wk; Wv]
    b_in = params["in_proj_bias"]                     # (3E,)
    E = w_in.shape[1]
    dh = E // num_heads
    scale = 1.0 / math.sqrt(dh)

    wq, wk, wv = jnp.split(w_in, 3, axis=0)           # (E, E) each
    bq, bk, bv = jnp.split(b_in, 3, axis=0)           # (E,) each

    # Pre-transpose for x @ W; fold 1/sqrt(dh) into the Q weight & bias.
    w_qkv = jnp.concatenate([wq.T * scale, wk.T, wv.T], axis=1)      # (E, 3E)
    b_qkv = jnp.concatenate([bq * scale, bk, bv]).reshape(1, 3 * E)  # (1, 3E)
    w_out = params["out_proj_weight"].T                              # (E, E)
    b_out = params["out_proj_bias"].reshape(1, E)                    # (1, E)

    return {
        "w_qkv": w_qkv.astype(compute_dtype),
        "b_qkv": b_qkv.astype(jnp.float32),   # biases stay f32 (added post-acc)
        "w_out": w_out.astype(compute_dtype),
        "b_out": b_out.astype(jnp.float32),
    }


# ----------------------------------------------------------------------------
# Forward wrapper: ONE pallas_call, nothing else
# ----------------------------------------------------------------------------
def attention_layer_forward(x, prepped, num_heads):
    """Equivalent of AttentionLayer.forward (self multi-head attention).

    x: (L, B, E) float32, returns (L, B, E) float32.
    """
    L, B, E = x.shape
    assert E % num_heads == 0
    dh = E // num_heads

    kernel = functools.partial(_fused_mha_kernel, seq_len=L, batch=B,
                               num_heads=num_heads, head_dim=dh)

    # No grid: the whole (small) problem is a single VMEM-resident block, so
    # there is no per-step overhead and weights are loaded exactly once.
    return pl.pallas_call(
        kernel,
        out_shape=jax.ShapeDtypeStruct((L, B, E), jnp.float32),
    )(x, prepped["w_qkv"], prepped["b_qkv"], prepped["w_out"], prepped["b_out"])


# ----------------------------------------------------------------------------
# Pure-JAX reference (for correctness check)
# ----------------------------------------------------------------------------
def reference_mha(x, params, num_heads):
    L, B, E = x.shape
    dh = E // num_heads
    hi = lax.Precision.HIGHEST
    qkv = jnp.einsum("lbe,fe->lbf", x, params["in_proj_weight"],
                     precision=hi) + params["in_proj_bias"]
    q, k, v = jnp.split(qkv, 3, axis=-1)

    def heads(t):  # (L, B, E) -> (B, H, L, dh)
        return t.reshape(L, B, num_heads, dh).transpose(1, 2, 0, 3)

    q, k, v = heads(q), heads(k), heads(v)
    scores = jnp.einsum("bhld,bhmd->bhlm", q, k, precision=hi) / math.sqrt(dh)
    p = jax.nn.softmax(scores, axis=-1)
    ctx = jnp.einsum("bhlm,bhmd->bhld", p, v, precision=hi)
    ctx = ctx.transpose(2, 0, 1, 3).reshape(L, B, E)
    out = jnp.einsum("lbe,fe->lbf", ctx, params["out_proj_weight"],
                     precision=hi) + params["out_proj_bias"]
    return out


# ----------------------------------------------------------------------------
# Main
# ----------------------------------------------------------------------------
if __name__ == "__main__":
    L, B, E, H = 8, 2, 32, 8   # seq_len, batch, embed_dim, num_heads

    key = jax.random.PRNGKey(0)
    k_x, k_w_in, k_b_in, k_w_out, k_b_out = jax.random.split(key, 5)

    x = jax.random.normal(k_x, (L, B, E), dtype=jnp.float32)

    # Synthetic parameters with nn.MultiheadAttention shapes:
    #   in_proj_weight: (3E, E), in_proj_bias: (3E,)
    #   out_proj.weight: (E, E), out_proj.bias: (E,)
    xav = math.sqrt(6.0 / (E + 3 * E))
    bound = 1.0 / math.sqrt(E)
    params = {
        "in_proj_weight": jax.random.uniform(
            k_w_in, (3 * E, E), minval=-xav, maxval=xav, dtype=jnp.float32),
        "in_proj_bias": jax.random.uniform(
            k_b_in, (3 * E,), minval=-bound, maxval=bound, dtype=jnp.float32),
        "out_proj_weight": jax.random.uniform(
            k_w_out, (E, E), minval=-bound, maxval=bound, dtype=jnp.float32),
        "out_proj_bias": jax.random.uniform(
            k_b_out, (E,), minval=-bound, maxval=bound, dtype=jnp.float32),
    }

    ref = jax.block_until_ready(reference_mha(x, params, num_heads=H))

    # f32 MXU inputs: bit-close parity with the PyTorch module.
    prepped_f32 = prepare_attention_params(params, H, compute_dtype=jnp.float32)
    out_f32 = jax.block_until_ready(attention_layer_forward(x, prepped_f32, H))
    assert out_f32.shape == (L, B, E)
    assert jnp.allclose(out_f32, ref, atol=2e-3, rtol=2e-3), (
        "f32 kernel mismatch vs pure-JAX reference")

    # bf16 MXU inputs (full-rate MXU on v6e/v7x), f32 accumulation.
    prepped_bf16 = prepare_attention_params(params, H, compute_dtype=jnp.bfloat16)
    out_bf16 = jax.block_until_ready(attention_layer_forward(x, prepped_bf16, H))
    assert jnp.allclose(out_bf16, ref, atol=2e-2, rtol=2e-2), (
        "bf16 kernel mismatch vs pure-JAX reference")

    print("KERNEL_OK")
</pallas_src>

<mosaic_0001>
module attributes {stable_mosaic.version = 11 : i64} {
  func.func @_fused_mha_kernel(%arg0: memref<8x2x32xf32, #tpu.memory_space<vmem>>, %arg1: memref<32x96xf32, #tpu.memory_space<vmem>>, %arg2: memref<1x96xf32, #tpu.memory_space<vmem>>, %arg3: memref<32x32xf32, #tpu.memory_space<vmem>>, %arg4: memref<1x32xf32, #tpu.memory_space<vmem>>, %arg5: memref<8x2x32xf32, #tpu.memory_space<vmem>>) attributes {dimension_semantics = [], scalar_prefetch = 0 : i64, scratch_operands = 0 : i64, tpu.core_type = #tpu.core_type<tc>} {
    %c0 = arith.constant 0 : index
    %c0_0 = arith.constant 0 : index
    %c0_1 = arith.constant 0 : index
    %0 = vector.load %arg0[%c0, %c0_0, %c0_1] : memref<8x2x32xf32, #tpu.memory_space<vmem>>, vector<8x2x32xf32>
    %1 = vector.extract_strided_slice %0 {offsets = [0, 0, 0], sizes = [8, 1, 32], strides = [1, 1, 1]} : vector<8x2x32xf32> to vector<8x1x32xf32>
    %2 = vector.shape_cast %1 : vector<8x1x32xf32> to vector<8x32xf32>
    %3 = vector.extract_strided_slice %0 {offsets = [0, 1, 0], sizes = [8, 1, 32], strides = [1, 1, 1]} : vector<8x2x32xf32> to vector<8x1x32xf32>
    %4 = vector.shape_cast %3 : vector<8x1x32xf32> to vector<8x32xf32>
    %5 = tpu.concatenate %2, %4 in 0 : vector<8x32xf32>, vector<8x32xf32> -> vector<16x32xf32>
    %c0_2 = arith.constant 0 : index
    %c0_3 = arith.constant 0 : index
    %6 = vector.load %arg1[%c0_2, %c0_3] : memref<32x96xf32, #tpu.memory_space<vmem>>, vector<32x96xf32>
    %cst = arith.constant dense<0.000000e+00> : vector<16x96xf32>
    %7 = tpu.matmul %5, %6, %cst {dimension_numbers = #tpu.dot_dimension_numbers<[1], [0], [0], [1], [0, 0, 1, 1], [], []>} : vector<16x32xf32>, vector<32x96xf32>, vector<16x96xf32> -> vector<16x96xf32>
    %c0_4 = arith.constant 0 : index
    %c0_5 = arith.constant 0 : index
    %8 = vector.load %arg2[%c0_4, %c0_5] : memref<1x96xf32, #tpu.memory_space<vmem>>, vector<1x96xf32>
    %9 = vector.broadcast %8 : vector<1x96xf32> to vector<16x96xf32>
    %10 = arith.addf %7, %9 : vector<16x96xf32>
    %11 = vector.extract_strided_slice %10 {offsets = [0, 0], sizes = [16, 4], strides = [1, 1]} : vector<16x96xf32> to vector<16x4xf32>
    %12 = vector.shape_cast %11 : vector<16x4xf32> to vector<2x8x4xf32>
    %13 = vector.extract_strided_slice %10 {offsets = [0, 4], sizes = [16, 4], strides = [1, 1]} : vector<16x96xf32> to vector<16x4xf32>
    %14 = vector.shape_cast %13 : vector<16x4xf32> to vector<2x8x4xf32>
    %15 = vector.extract_strided_slice %10 {offsets = [0, 8], sizes = [16, 4], strides = [1, 1]} : vector<16x96xf32> to vector<16x4xf32>
    %16 = vector.shape_cast %15 : vector<16x4xf32> to vector<2x8x4xf32>
    %17 = vector.extract_strided_slice %10 {offsets = [0, 12], sizes = [16, 4], strides = [1, 1]} : vector<16x96xf32> to vector<16x4xf32>
    %18 = vector.shape_cast %17 : vector<16x4xf32> to vector<2x8x4xf32>
    %19 = vector.extract_strided_slice %10 {offsets = [0, 16], sizes = [16, 4], strides = [1, 1]} : vector<16x96xf32> to vector<16x4xf32>
    %20 = vector.shape_cast %19 : vector<16x4xf32> to vector<2x8x4xf32>
    %21 = vector.extract_strided_slice %10 {offsets = [0, 20], sizes = [16, 4], strides = [1, 1]} : vector<16x96xf32> to vector<16x4xf32>
    %22 = vector.shape_cast %21 : vector<16x4xf32> to vector<2x8x4xf32>
    %23 = vector.extract_strided_slice %10 {offsets = [0, 24], sizes = [16, 4], strides = [1, 1]} : vector<16x96xf32> to vector<16x4xf32>
    %24 = vector.shape_cast %23 : vector<16x4xf32> to vector<2x8x4xf32>
    %25 = vector.extract_strided_slice %10 {offsets = [0, 28], sizes = [16, 4], strides = [1, 1]} : vector<16x96xf32> to vector<16x4xf32>
    %26 = vector.shape_cast %25 : vector<16x4xf32> to vector<2x8x4xf32>
    %27 = tpu.concatenate %12, %14, %16, %18, %20, %22, %24, %26 in 0 : vector<2x8x4xf32>, vector<2x8x4xf32>, vector<2x8x4xf32>, vector<2x8x4xf32>, vector<2x8x4xf32>, vector<2x8x4xf32>, vector<2x8x4xf32>, vector<2x8x4xf32> -> vector<16x8x4xf32>
    %28 = vector.extract_strided_slice %10 {offsets = [0, 32], sizes = [16, 4], strides = [1, 1]} : vector<16x96xf32> to vector<16x4xf32>
    %29 = vector.shape_cast %28 : vector<16x4xf32> to vector<2x8x4xf32>
    %30 = vector.extract_strided_slice %10 {offsets = [0, 36], sizes = [16, 4], strides = [1, 1]} : vector<16x96xf32> to vector<16x4xf32>
    %31 = vector.shape_cast %30 : vector<16x4xf32> to vector<2x8x4xf32>
    %32 = vector.extract_strided_slice %10 {offsets = [0, 40], sizes = [16, 4], strides = [1, 1]} : vector<16x96xf32> to vector<16x4xf32>
    %33 = vector.shape_cast %32 : vector<16x4xf32> to vector<2x8x4xf32>
    %34 = vector.extract_strided_slice %10 {offsets = [0, 44], sizes = [16, 4], strides = [1, 1]} : vector<16x96xf32> to vector<16x4xf32>
    %35 = vector.shape_cast %34 : vector<16x4xf32> to vector<2x8x4xf32>
    %36 = vector.extract_strided_slice %10 {offsets = [0, 48], sizes = [16, 4], strides = [1, 1]} : vector<16x96xf32> to vector<16x4xf32>
    %37 = vector.shape_cast %36 : vector<16x4xf32> to vector<2x8x4xf32>
    %38 = vector.extract_strided_slice %10 {offsets = [0, 52], sizes = [16, 4], strides = [1, 1]} : vector<16x96xf32> to vector<16x4xf32>
    %39 = vector.shape_cast %38 : vector<16x4xf32> to vector<2x8x4xf32>
    %40 = vector.extract_strided_slice %10 {offsets = [0, 56], sizes = [16, 4], strides = [1, 1]} : vector<16x96xf32> to vector<16x4xf32>
    %41 = vector.shape_cast %40 : vector<16x4xf32> to vector<2x8x4xf32>
    %42 = vector.extract_strided_slice %10 {offsets = [0, 60], sizes = [16, 4], strides = [1, 1]} : vector<16x96xf32> to vector<16x4xf32>
    %43 = vector.shape_cast %42 : vector<16x4xf32> to vector<2x8x4xf32>
    %44 = tpu.concatenate %29, %31, %33, %35, %37, %39, %41, %43 in 0 : vector<2x8x4xf32>, vector<2x8x4xf32>, vector<2x8x4xf32>, vector<2x8x4xf32>, vector<2x8x4xf32>, vector<2x8x4xf32>, vector<2x8x4xf32>, vector<2x8x4xf32> -> vector<16x8x4xf32>
    %45 = vector.extract_strided_slice %10 {offsets = [0, 64], sizes = [16, 4], strides = [1, 1]} : vector<16x96xf32> to vector<16x4xf32>
    %46 = vector.shape_cast %45 : vector<16x4xf32> to vector<2x8x4xf32>
    %47 = vector.extract_strided_slice %10 {offsets = [0, 68], sizes = [16, 4], strides = [1, 1]} : vector<16x96xf32> to vector<16x4xf32>
    %48 = vector.shape_cast %47 : vector<16x4xf32> to vector<2x8x4xf32>
    %49 = vector.extract_strided_slice %10 {offsets = [0, 72], sizes = [16, 4], strides = [1, 1]} : vector<16x96xf32> to vector<16x4xf32>
    %50 = vector.shape_cast %49 : vector<16x4xf32> to vector<2x8x4xf32>
    %51 = vector.extract_strided_slice %10 {offsets = [0, 76], sizes = [16, 4], strides = [1, 1]} : vector<16x96xf32> to vector<16x4xf32>
    %52 = vector.shape_cast %51 : vector<16x4xf32> to vector<2x8x4xf32>
    %53 = vector.extract_strided_slice %10 {offsets = [0, 80], sizes = [16, 4], strides = [1, 1]} : vector<16x96xf32> to vector<16x4xf32>
    %54 = vector.shape_cast %53 : vector<16x4xf32> to vector<2x8x4xf32>
    %55 = vector.extract_strided_slice %10 {offsets = [0, 84], sizes = [16, 4], strides = [1, 1]} : vector<16x96xf32> to vector<16x4xf32>
    %56 = vector.shape_cast %55 : vector<16x4xf32> to vector<2x8x4xf32>
    %57 = vector.extract_strided_slice %10 {offsets = [0, 88], sizes = [16, 4], strides = [1, 1]} : vector<16x96xf32> to vector<16x4xf32>
    %58 = vector.shape_cast %57 : vector<16x4xf32> to vector<2x8x4xf32>
    %59 = vector.extract_strided_slice %10 {offsets = [0, 92], sizes = [16, 4], strides = [1, 1]} : vector<16x96xf32> to vector<16x4xf32>
    %60 = vector.shape_cast %59 : vector<16x4xf32> to vector<2x8x4xf32>
    %61 = tpu.concatenate %46, %48, %50, %52, %54, %56, %58, %60 in 0 : vector<2x8x4xf32>, vector<2x8x4xf32>, vector<2x8x4xf32>, vector<2x8x4xf32>, vector<2x8x4xf32>, vector<2x8x4xf32>, vector<2x8x4xf32>, vector<2x8x4xf32> -> vector<16x8x4xf32>
    "tpu.trace_start"() <{level = 10 : i32, message = "gld,gmd->glm"}> : () -> ()
    %cst_6 = arith.constant dense<0.000000e+00> : vector<16x8x8xf32>
    %62 = tpu.matmul %27, %44, %cst_6 {dimension_numbers = #tpu.dot_dimension_numbers<[2], [2], [1], [1], [0, 0, 0, 1, 1, 1], [0], [0]>} : vector<16x8x4xf32>, vector<16x8x4xf32>, vector<16x8x8xf32> -> vector<16x8x8xf32>
    "tpu.trace_stop"() : () -> ()
    %63 = vector.shape_cast %62 : vector<16x8x8xf32> to vector<128x8xf32>
    %cst_7 = arith.constant dense<0xFF800000> : vector<128xf32>
    %64 = vector.multi_reduction <maximumf>, %63, %cst_7 [1] : vector<128x8xf32> to vector<128xf32>
    %65 = vector.shape_cast %64 : vector<128xf32> to vector<128x1xf32>
    %66 = vector.broadcast %65 : vector<128x1xf32> to vector<128x8xf32>
    %67 = arith.subf %63, %66 : vector<128x8xf32>
    %68 = math.exp %67 : vector<128x8xf32>
    %cst_8 = arith.constant dense<0.000000e+00> : vector<128xf32>
    %69 = vector.multi_reduction <add>, %68, %cst_8 [1] : vector<128x8xf32> to vector<128xf32>
    %70 = vector.shape_cast %69 : vector<128xf32> to vector<128x1xf32>
    %71 = tpu.reciprocal %70 {approx = true} : vector<128x1xf32> -> vector<128x1xf32>
    %72 = vector.broadcast %71 : vector<128x1xf32> to vector<128x8xf32>
    %73 = arith.mulf %68, %72 : vector<128x8xf32>
    %74 = vector.shape_cast %73 : vector<128x8xf32> to vector<16x8x8xf32>
    "tpu.trace_start"() <{level = 10 : i32, message = "glm,gmd->gld"}> : () -> ()
    %cst_9 = arith.constant dense<0.000000e+00> : vector<16x8x4xf32>
    %75 = tpu.matmul %74, %61, %cst_9 {dimension_numbers = #tpu.dot_dimension_numbers<[2], [1], [1], [2], [0, 0, 0, 1, 1, 2], [0], [0]>} : vector<16x8x8xf32>, vector<16x8x4xf32>, vector<16x8x4xf32> -> vector<16x8x4xf32>
    "tpu.trace_stop"() : () -> ()
    %76 = vector.extract_strided_slice %75 {offsets = [0, 0, 0], sizes = [2, 8, 4], strides = [1, 1, 1]} : vector<16x8x4xf32> to vector<2x8x4xf32>
    %77 = vector.shape_cast %76 : vector<2x8x4xf32> to vector<16x4xf32>
    %78 = vector.extract_strided_slice %75 {offsets = [2, 0, 0], sizes = [2, 8, 4], strides = [1, 1, 1]} : vector<16x8x4xf32> to vector<2x8x4xf32>
    %79 = vector.shape_cast %78 : vector<2x8x4xf32> to vector<16x4xf32>
    %80 = vector.extract_strided_slice %75 {offsets = [4, 0, 0], sizes = [2, 8, 4], strides = [1, 1, 1]} : vector<16x8x4xf32> to vector<2x8x4xf32>
    %81 = vector.shape_cast %80 : vector<2x8x4xf32> to vector<16x4xf32>
    %82 = vector.extract_strided_slice %75 {offsets = [6, 0, 0], sizes = [2, 8, 4], strides = [1, 1, 1]} : vector<16x8x4xf32> to vector<2x8x4xf32>
    %83 = vector.shape_cast %82 : vector<2x8x4xf32> to vector<16x4xf32>
    %84 = vector.extract_strided_slice %75 {offsets = [8, 0, 0], sizes = [2, 8, 4], strides = [1, 1, 1]} : vector<16x8x4xf32> to vector<2x8x4xf32>
    %85 = vector.shape_cast %84 : vector<2x8x4xf32> to vector<16x4xf32>
    %86 = vector.extract_strided_slice %75 {offsets = [10, 0, 0], sizes = [2, 8, 4], strides = [1, 1, 1]} : vector<16x8x4xf32> to vector<2x8x4xf32>
    %87 = vector.shape_cast %86 : vector<2x8x4xf32> to vector<16x4xf32>
    %88 = vector.extract_strided_slice %75 {offsets = [12, 0, 0], sizes = [2, 8, 4], strides = [1, 1, 1]} : vector<16x8x4xf32> to vector<2x8x4xf32>
    %89 = vector.shape_cast %88 : vector<2x8x4xf32> to vector<16x4xf32>
    %90 = vector.extract_strided_slice %75 {offsets = [14, 0, 0], sizes = [2, 8, 4], strides = [1, 1, 1]} : vector<16x8x4xf32> to vector<2x8x4xf32>
    %91 = vector.shape_cast %90 : vector<2x8x4xf32> to vector<16x4xf32>
    %92 = tpu.concatenate %77, %79, %81, %83, %85, %87, %89, %91 in 1 : vector<16x4xf32>, vector<16x4xf32>, vector<16x4xf32>, vector<16x4xf32>, vector<16x4xf32>, vector<16x4xf32>, vector<16x4xf32>, vector<16x4xf32> -> vector<16x32xf32>
    %c0_10 = arith.constant 0 : index
    %c0_11 = arith.constant 0 : index
    %93 = vector.load %arg3[%c0_10, %c0_11] : memref<32x32xf32, #tpu.memory_space<vmem>>, vector<32x32xf32>
    %cst_12 = arith.constant dense<0.000000e+00> : vector<16x32xf32>
    %94 = tpu.matmul %92, %93, %cst_12 {dimension_numbers = #tpu.dot_dimension_numbers<[1], [0], [0], [1], [0, 0, 1, 1], [], []>} : vector<16x32xf32>, vector<32x32xf32>, vector<16x32xf32> -> vector<16x32xf32>
    %c0_13 = arith.constant 0 : index
    %c0_14 = arith.constant 0 : index
    %95 = vector.load %arg4[%c0_13, %c0_14] : memref<1x32xf32, #tpu.memory_space<vmem>>, vector<1x32xf32>
    %96 = vector.broadcast %95 : vector<1x32xf32> to vector<16x32xf32>
    %97 = arith.addf %94, %96 : vector<16x32xf32>
    %98 = vector.extract_strided_slice %97 {offsets = [0, 0], sizes = [8, 32], strides = [1, 1]} : vector<16x32xf32> to vector<8x32xf32>
    %c0_15 = arith.constant 0 : index
    %c0_16 = arith.constant 0 : index
    %c0_17 = arith.constant 0 : index
    %99 = vector.load %arg5[%c0_15, %c0_16, %c0_17] : memref<8x2x32xf32, #tpu.memory_space<vmem>>, vector<8x1x32xf32>
    %100 = vector.shape_cast %99 : vector<8x1x32xf32> to vector<8x32xf32>
    %101 = vector.shape_cast %98 : vector<8x32xf32> to vector<8x1x32xf32>
    tpu.vector_store %arg5[%c0_15, %c0_16, %c0_17], %101 {strides = array<i32>} : memref<8x2x32xf32, #tpu.memory_space<vmem>>, vector<8x1x32xf32>,
    %102 = vector.extract_strided_slice %97 {offsets = [8, 0], sizes = [8, 32], strides = [1, 1]} : vector<16x32xf32> to vector<8x32xf32>
    %c0_18 = arith.constant 0 : index
    %c1 = arith.constant 1 : index
    %c0_19 = arith.constant 0 : index
    %103 = vector.load %arg5[%c0_18, %c1, %c0_19] : memref<8x2x32xf32, #tpu.memory_space<vmem>>, vector<8x1x32xf32>
    %104 = vector.shape_cast %103 : vector<8x1x32xf32> to vector<8x32xf32>
    %105 = vector.shape_cast %102 : vector<8x32xf32> to vector<8x1x32xf32>
    tpu.vector_store %arg5[%c0_18, %c1, %c0_19], %105 {strides = array<i32>} : memref<8x2x32xf32, #tpu.memory_space<vmem>>, vector<8x1x32xf32>,
    return
  }
}

</mosaic_0001>

<bundles_post_ra>
// kernel: tpu_custom_call.1
= control target key start
LH: loop header
LB: loop body
LE: loop exit
PB: predicated region body
PF: predicated region fallthrough
CT: control target
= control target key end

     0   :  { %10 = vsyncpa [#allocation3], 0  ;;  %s4248_s0 = inlined_call_operand.hbm [shape: f32[8,2,32], index: 0, kind: input, shape index: {}]   ;;  %s4249_s1 = inlined_call_operand.hbm [shape: f32[32,96], index: 1, kind: input, shape index: {}]   ;;  %s4250_s2 = inlined_call_operand.vmem [shape: f32[1,96], index: 2, kind: input, shape index: {}]   ;;  %s4251_s3 = inlined_call_operand.hbm [shape: f32[32,32], index: 3, kind: input, shape index: {}]   ;;  %s4252_s4 = inlined_call_operand.vmem [shape: f32[1,32], index: 4, kind: input, shape index: {}]   ;;  %s4253_s5 = inlined_call_operand.hbm [shape: f32[8,2,32], index: 5, kind: output, shape index: {}]  }
   0x1   :  { %11 = vsyncpa [#allocation6], 0 }
   0x2   :  { %12 = vsyncpa [#allocation4], 0  ;;  %s3650_s18 = smov [#allocation5]  }
   0x3   :  { %s30_s19 = sshll.u32 %s3650_s18, 4  ;;  %s31_s19 = int_to_ptr.vmem [resolvable:$true] %s30_s19 }
   0x4   :  { %s3572_s20 = scalar_lea.vmem %s31_s19, 512  ;;  %p3577_p1 = scmp.lt.s32.totalorder %s31_s19, %s31_s19 }
   0x5   :  { %p3573_p0 = scmp.ne.s32.totalorder %s31_s19, %s3572_s20  ;;  %p3578_p2 = scmp.lt.s32.totalorder %s3572_s20, %s3572_s20 }
   0x7   :  { %p3579_p3 = por %p3578_p2, %p3577_p1 }
   0x9   :  { %p3580_p4 = pnand %p3579_p3, %p3573_p0 }
   0xb   :  { %3583 = shalt.err (!%p3580_p4)
}
   0xc   :  { %s3651_s21 = smov 128   ;;  %s3652_s22 = smov 8  }
   0xd   :  { %36 = dma.hbm_to_vmem [thread:$0]  %s4249_s1, 512, %s31_s19, [#allocation6], %s3651_s21, %s3651_s21, %s3652_s22  }
   0xe   :  { %s3653_s25 = smov [#allocation2]  }
   0xf   :  { %s18_s26 = sshll.u32 %s3653_s25, 4  ;;  %s19_s26 = int_to_ptr.vmem [resolvable:$true] %s18_s26 }
  0x10   :  { %s3592_s27 = scalar_lea.vmem %s19_s26, 256  ;;  %p3597_p6 = scmp.lt.s32.totalorder %s19_s26, %s19_s26 }
  0x11   :  { %p3593_p5 = scmp.ne.s32.totalorder %s19_s26, %s3592_s27  ;;  %p3598_p7 = scmp.lt.s32.totalorder %s3592_s27, %s3592_s27 }
  0x13   :  { %p3599_p8 = por %p3598_p7, %p3597_p6 }
  0x15   :  { %p3600_p9 = pnand %p3599_p8, %p3593_p5 }
  0x17   :  { %3603 = shalt.err (!%p3600_p9)
}
  0x18   :  { %s3654_s28 = smov 32   ;;  %s3655_s29 = smov 2  }
  0x19   :  { %24 = dma.hbm_to_vmem [thread:$0]  %s4248_s0, 256, %s19_s26, [#allocation3], %s3654_s28, %s3654_s28, %s3655_s29  }
  0x1a   :  { %s3656_s1 = smov [#allocation7]  }
  0x1b   :  { %s44_s7 = sshll.u32 %s3656_s1, 4  ;;  %s45_s7 = int_to_ptr.vmem [resolvable:$true] %s44_s7 }
  0x1c   :  { %s3612_s8 = scalar_lea.vmem %s45_s7, 512  ;;  %p3617_p11 = scmp.lt.s32.totalorder %s45_s7, %s45_s7 }
  0x1d   :  { %p3613_p10 = scmp.ne.s32.totalorder %s45_s7, %s3612_s8  ;;  %p3618_p12 = scmp.lt.s32.totalorder %s3612_s8, %s3612_s8 }
  0x1f   :  { %p3619_p13 = por %p3618_p12, %p3617_p11 }
  0x21   :  { %p3620_p0 = pnand %p3619_p13, %p3613_p10 }
  0x23   :  { %3623 = shalt.err (!%p3620_p0)
}
  0x24   :  { %50 = dma.hbm_to_vmem [thread:$0]  %s4251_s3, 512, %s45_s7, [#allocation6], %s3651_s21, %s3651_s21, %s3652_s22  }
  0x25   :  { %3644 = dma.done.wait [#allocation3], 256  }
  0x26   :  { %3645 = vsyncadd [#allocation3], 4294967040 }
  0x27   :  { %3646 = dma.done.wait [#allocation6], 1024  }
  0x28   :  { %3647 = vsyncadd [#allocation6], 4294966272  ;;  %v116_v0 = vld [vmem:[#allocation5 + $0x18] sm:$0xff]  ;;  %v115_v1 = vld [vmem:[#allocation5 + $0x10] sm:$0xff]  ;;  %vm79_vm0 = vcmask 1041409   ;;  %vm82_vm1 = vcmask 1042434  }
  0x29   :  { %3292 = vmatprep.subr.mxu0 %v116_v0  ;;  %v114_v2 = vld [vmem:[#allocation5 + $0x8] sm:$0xff]  ;;  %v62_v3 = vld [vmem:[#allocation2] sm:$0x3]  ;;  %v63_v4 = vld [vmem:[#allocation2 + $0x2] sm:$0x3]  ;;  %vm85_vm2 = vcmask 1043459  }
  0x2a   :  { %3293 = vmatpush3.msra.mxu0 %v116_v0  ;;  %v64_v5 = vld [vmem:[#allocation2 + $0x4] sm:$0x3]  ;;  %v65_v6 = vld [vmem:[#allocation2 + $0x6] sm:$0x3]  ;;  %v66_v7 = vld [vmem:[#allocation2 + $0x8] sm:$0x3] }
  0x2b   :  { %3294 = vmatprep.subr.mxu0 %v115_v1  ;;  %v67_v8 = vld [vmem:[#allocation2 + $0xa] sm:$0x3]  ;;  %v113_v9 = vld [vmem:[#allocation5] sm:$0xff]  ;;  %v68_v10 = vld [vmem:[#allocation2 + $0xc] sm:$0x3]  ;;  %v78_v11 = vrot.slane %v63_v4, 7 }
  0x2c   :  { %3295 = vmatpush3.msra.mxu0 %v115_v1  ;;  %v81_v12 = vrot.slane %v64_v5, 6  ;;  %v84_v13 = vrot.slane %v65_v6, 5  ;;  %v69_v14 = vld [vmem:[#allocation2 + $0xe] sm:$0x3]  ;;  %v87_v15 = vrot.slane %v66_v7, 4  ;;  %vm88_vm3 = vcmask 1044484  }
  0x2d   :  { %3296 = vmatprep.subr.mxu0 %v114_v2  ;;  %vm91_vm4 = vcmask 1045509   ;;  %v99_v16 = vrot.slane %v62_v3, 1  ;;  %v80_v17 = vsel %vm79_vm0, %v78_v11, %v62_v3  ;;  %v90_v18 = vrot.slane %v67_v8, 3  ;;  %v3162_v41 = vld [vmem:[%s4250_s2] ss:$0 sm:$0xff]  ;;  %s3657_s11 = smov 120  }
  0x2e   :  { %3297 = vmatpush3.msra.mxu0 %v114_v2  ;;  %v101_v19 = vrot.slane %v64_v5, 7  ;;  %v103_v20 = vrot.slane %v65_v6, 6  ;;  %v83_v21 = vsel %vm82_vm1, %v81_v12, %v80_v17  ;;  %v93_v22 = vrot.slane %v68_v10, 2  ;;  %s3658_s12 = smov 124   ;;  %s3659_s13 = smov 116  }
  0x2f   :  { %3298 = vmatprep.subr.mxu0 %v113_v9  ;;  %vm94_vm5 = vcmask 1046534   ;;  %v105_v23 = vrot.slane %v66_v7, 5  ;;  %v86_v24 = vsel %vm85_vm2, %v84_v13, %v83_v21  ;;  %v96_v25 = vrot.slane %v69_v14, 1  ;;  %s3660_s2 = smov 112   ;;  %s3662_s14 = smov 108  }
  0x30   :  { %3299 = vmatpush3.msra.mxu0 %v113_v9  ;;  %v107_v26 = vrot.slane %v67_v8, 4  ;;  %v100_v27 = vsel %vm79_vm0, %v63_v4, %v99_v16  ;;  %v89_v28 = vsel %vm88_vm3, %v87_v15, %v86_v24  ;;  %vm97_vm6 = vcmask 1047559   ;;  %s3664_s15 = smov 104   ;;  %s3665_s16 = smov 100  }
  0x31   :  { %v109_v29 = vrot.slane %v68_v10, 3  ;;  %v102_v30 = vsel %vm82_vm1, %v101_v19, %v100_v27  ;;  %v92_v31 = vsel %vm91_vm4, %v90_v18, %v89_v28  ;;  %v111_v32 = vrot.slane %v69_v14, 2  ;;  %s3666_s17 = smov 96   ;;  %s3667_s18 = smov 64  }
  0x32   :  { %vm124_vm7 = vcmask 261120   ;;  %v104_v33 = vsel %vm85_vm2, %v103_v20, %v102_v30  ;;  %v95_v34 = vsel %vm94_vm5, %v93_v22, %v92_v31  ;;  %v3661_v45 = vmov 0.0   ;;  %s3668_s19 = smov 4   ;;  %s3669_s20 = smov 12  }
  0x33   :  { %v106_v35 = vsel %vm88_vm3, %v105_v23, %v104_v33  ;;  %v98_v36 = vsel %vm97_vm6, %v96_v25, %v95_v34  ;;  %3303 = vmatprep.subr.mxu1 %v3661_v45  ;;  %3323 = vmatprep.subr.mxu0 %v3661_v45  ;;  %vm3663_vm8 = vmmov 0   ;;  %vm236_vm9 = vcmask 31744   ;;  %s3670_s21 = smov 16   ;;  %s3671_s23 = smov 20  }
  0x34   :  { %v108_v37 = vsel %vm91_vm4, %v107_v26, %v106_v35  ;;  %3300 = vmatprep.mubr.msk.f32.mxu0 %vm124_vm7, %v98_v36  ;;  %3305 = vmatprep.mubr.msk.f32.mxu1 %vm3663_vm8, %v3661_v45  ;;  %vm1451_vm10 = vcmask 64512   ;;  %s3672_s24 = smov 24   ;;  %vm2904_vm11 = vcmask 97280   ;;  %vm2907_vm12 = vcmask 130048  }
  0x35   :  { %v110_v38 = vsel %vm94_vm5, %v109_v29, %v108_v37  ;;  %vm2910_vm13 = vcmask 162816   ;;  %vm2913_vm14 = vcmask 195584   ;;  %vm2916_vm15 = vcmask 228352  }
  0x36   :  { %v112_v39 = vsel %vm97_vm6, %v111_v32, %v110_v38  ;;  %vm3069_vm0 = vcmask 253952  }
  0x37   :  { %3301 = vmatmul.mubr.msk.f32.vlgmr.msra.gmra.mxu0 %vm124_vm7, %v112_v39 }
  0x38   :  { %3325 = vmatprep.mubr.msk.f32.mxu0 %vm3663_vm8, %v3661_v45 }
  0xf7   :  { %v3302_v40 = vpop.f32.mrf.mxu0 }
  0xf8   :  { %v3741_v44 = vadd.f32 %v3302_v40, %v3162_v41 }
  0xf9   :  { %v195_v42 = vpop.f32.mrf.mxu0 }
  0xfa   :  { %v3737_v43 = vadd.f32 %v3162_v41, %v195_v42 }
  0xfc   :  { %210 = vrot.lane.b32.xlu1 %v3737_v43, %s3657_s11  ;;  %206 = vrot.lane.b32.xlu0 %v3737_v43, %s3658_s12 }
 0x100   :  { %212 = vrot.lane.b32.xlu1 %v3741_v44, %s3657_s11  ;;  %208 = vrot.lane.b32.xlu0 %v3741_v44, %s3658_s12 }
 0x104   :  { %216 = vrot.lane.b32.xlu1 %v3741_v44, %s3659_s13  ;;  %214 = vrot.lane.b32.xlu0 %v3737_v43, %s3659_s13 }
 0x108   :  { %220 = vrot.lane.b32.xlu1 %v3741_v44, %s3660_s2  ;;  %218 = vrot.lane.b32.xlu0 %v3737_v43, %s3660_s2 }
 0x10c   :  { %224 = vrot.lane.b32.xlu1 %v3741_v44, %s3662_s14  ;;  %222 = vrot.lane.b32.xlu0 %v3737_v43, %s3662_s14 }
 0x110   :  { %228 = vrot.lane.b32.xlu1 %v3741_v44, %s3664_s15  ;;  %226 = vrot.lane.b32.xlu0 %v3737_v43, %s3664_s15 }
 0x114   :  { %232 = vrot.lane.b32.xlu1 %v3741_v44, %s3665_s16  ;;  %230 = vrot.lane.b32.xlu0 %v3737_v43, %s3665_s16 }
 0x118   :  { %311 = vrot.lane.b32.xlu1 %v3741_v44, %s3666_s17  ;;  %234 = vrot.lane.b32.xlu0 %v3737_v43, %s3666_s17 }
 0x16e   :  { %v3765_v46 = vpop.permute.xlu1 %210  ;;  %v3767_v47 = vpop.permute.xlu0 %206 }
 0x16f   :  { %387 = vrot.lane.b32.xlu0 %v3767_v47, %s3666_s17 }
 0x172   :  { %v3771_v48 = vpop.permute.xlu1 %212  ;;  %v3773_v49 = vpop.permute.xlu0 %208 }
 0x173   :  { %539 = vrot.lane.b32.xlu0 %v3765_v46, %s3666_s17  ;;  %463 = vrot.lane.b32.xlu1 %v3773_v49, %s3666_s17 }
 0x176   :  { %v3779_v50 = vpop.permute.xlu1 %216  ;;  %v3781_v51 = vpop.permute.xlu0 %214 }
 0x177   :  { %615 = vrot.lane.b32.xlu1 %v3771_v48, %s3666_s17  ;;  %691 = vrot.lane.b32.xlu0 %v3781_v51, %s3666_s17 }
 0x17a   :  { %v3787_v52 = vpop.permute.xlu1 %220  ;;  %v3789_v53 = vpop.permute.xlu0 %218 }
 0x17b   :  { %767 = vrot.lane.b32.xlu1 %v3779_v50, %s3666_s17  ;;  %843 = vrot.lane.b32.xlu0 %v3789_v53, %s3666_s17 }
 0x17e   :  { %v3795_v54 = vpop.permute.xlu1 %224  ;;  %v3797_v55 = vpop.permute.xlu0 %222 }
 0x17f   :  { %919 = vrot.lane.b32.xlu1 %v3787_v52, %s3666_s17  ;;  %995 = vrot.lane.b32.xlu0 %v3797_v55, %s3666_s17 }
 0x182   :  { %v3803_v56 = vpop.permute.xlu1 %228  ;;  %v3805_v57 = vpop.permute.xlu0 %226 }
 0x183   :  { %1071 = vrot.lane.b32.xlu1 %v3795_v54, %s3666_s17  ;;  %1147 = vrot.lane.b32.xlu0 %v3805_v57, %s3666_s17 }
 0x186   :  { %v3811_v58 = vpop.permute.xlu0 %230  ;;  %v3817_v59 = vpop.permute.xlu1 %232 }
 0x187   :  { %1223 = vrot.lane.b32.xlu1 %v3803_v56, %s3666_s17  ;;  %1299 = vrot.lane.b32.xlu0 %v3811_v58, %s3666_s17 }
 0x18a   :  { %v235_v60 = vpop.permute.xlu0 %234  ;;  %v312_v61 = vpop.permute.xlu1 %311 }
 0x18b   :  { %1375 = vrot.lane.b32.xlu1 %v3817_v59, %s3666_s17  ;;  %3304 = vmatpush3.xpose.msk.msra.mxu1 %vm236_vm9, %v235_v60 }
 0x18c   :  { %3308 = vmatprep.subr.mxu1 %v3661_v45 }
 0x18e   :  { %3306 = vmatmul.mubr.msk.f32.vlgmr.msra.gmra.mxu1 %vm236_vm9, %v3737_v43 }
 0x18f   :  { %3309 = vmatpush3.xpose.msk.msra.mxu1 %vm236_vm9, %v312_v61  ;;  %3310 = vmatprep.mubr.msk.f32.mxu1 %vm3663_vm8, %v3661_v45 }
 0x190   :  { %3313 = vmatprep.subr.mxu1 %v3661_v45 }
 0x192   :  { %3311 = vmatmul.mubr.msk.f32.vlgmr.msra.gmra.mxu1 %vm236_vm9, %v3741_v44 }
 0x193   :  { %3315 = vmatprep.mubr.msk.f32.mxu1 %vm3663_vm8, %v3661_v45 }
 0x1e1   :  { %v388_v62 = vpop.permute.xlu0 %387 }
 0x1e2   :  { %3314 = vmatpush3.xpose.msk.msra.mxu1 %vm236_vm9, %v388_v62 }
 0x1e3   :  { %3318 = vmatprep.subr.mxu1 %v3661_v45 }
 0x1e5   :  { %v464_v63 = vpop.permute.xlu1 %463  ;;  %3316 = vmatmul.mubr.msk.f32.vlgmr.msra.gmra.mxu1 %vm236_vm9, %v3767_v47  ;;  %v540_v0 = vpop.permute.xlu0 %539 }
 0x1e6   :  { %3319 = vmatpush3.xpose.msk.msra.mxu1 %vm236_vm9, %v464_v63  ;;  %3324 = vmatpush3.xpose.msk.msra.mxu0 %vm236_vm9, %v540_v0 }
 0x1e7   :  { %3320 = vmatprep.mubr.msk.f32.mxu1 %vm3663_vm8, %v3661_v45  ;;  %3328 = vmatprep.subr.mxu1 %v3661_v45 }
 0x1e8   :  { %3333 = vmatprep.subr.mxu0 %v3661_v45 }
 0x1e9   :  { %v616_v1 = vpop.permute.xlu1 %615  ;;  %3321 = vmatmul.mubr.msk.f32.vlgmr.msra.gmra.mxu1 %vm236_vm9, %v3773_v49  ;;  %3326 = vmatmul.mubr.msk.f32.vlgmr.msra.gmra.mxu0 %vm236_vm9, %v3765_v46  ;;  %v692_v2 = vpop.permute.xlu0 %691 }
 0x1ea   :  { %3329 = vmatpush3.xpose.msk.msra.mxu1 %vm236_vm9, %v616_v1  ;;  %3334 = vmatpush3.xpose.msk.msra.mxu0 %vm236_vm9, %v692_v2 }
 0x1eb   :  { %3330 = vmatprep.mubr.msk.f32.mxu1 %vm3663_vm8, %v3661_v45  ;;  %3335 = vmatprep.mubr.msk.f32.mxu0 %vm3663_vm8, %v3661_v45 }
 0x1ec   :  { %3338 = vmatprep.subr.mxu1 %v3661_v45  ;;  %3343 = vmatprep.subr.mxu0 %v3661_v45 }
 0x1ed   :  { %v768_v3 = vpop.permute.xlu1 %767  ;;  %3331 = vmatmul.mubr.msk.f32.vlgmr.msra.gmra.mxu1 %vm236_vm9, %v3771_v48  ;;  %3336 = vmatmul.mubr.msk.f32.vlgmr.msra.gmra.mxu0 %vm236_vm9, %v3781_v51  ;;  %v844_v4 = vpop.permute.xlu0 %843 }
 0x1ee   :  { %3339 = vmatpush3.xpose.msk.msra.mxu1 %vm236_vm9, %v768_v3  ;;  %3344 = vmatpush3.xpose.msk.msra.mxu0 %vm236_vm9, %v844_v4 }
 0x1ef   :  { %3340 = vmatprep.mubr.msk.f32.mxu1 %vm3663_vm8, %v3661_v45  ;;  %3345 = vmatprep.mubr.msk.f32.mxu0 %vm3663_vm8, %v3661_v45 }
 0x1f0   :  { %3348 = vmatprep.subr.mxu1 %v3661_v45  ;;  %3353 = vmatprep.subr.mxu0 %v3661_v45 }
 0x1f1   :  { %v920_v5 = vpop.permute.xlu1 %919  ;;  %3341 = vmatmul.mubr.msk.f32.vlgmr.msra.gmra.mxu1 %vm236_vm9, %v3779_v50  ;;  %3346 = vmatmul.mubr.msk.f32.vlgmr.msra.gmra.mxu0 %vm236_vm9, %v3789_v53  ;;  %v996_v6 = vpop.permute.xlu0 %995 }
 0x1f2   :  { %3349 = vmatpush3.xpose.msk.msra.mxu1 %vm236_vm9, %v920_v5  ;;  %3354 = vmatpush3.xpose.msk.msra.mxu0 %vm236_vm9, %v996_v6 }
 0x1f3   :  { %3350 = vmatprep.mubr.msk.f32.mxu1 %vm3663_vm8, %v3661_v45  ;;  %3355 = vmatprep.mubr.msk.f32.mxu0 %vm3663_vm8, %v3661_v45 }
 0x1f4   :  { %3358 = vmatprep.subr.mxu1 %v3661_v45  ;;  %3363 = vmatprep.subr.mxu0 %v3661_v45 }
 0x1f5   :  { %v1072_v7 = vpop.permute.xlu1 %1071  ;;  %3351 = vmatmul.mubr.msk.f32.vlgmr.msra.gmra.mxu1 %vm236_vm9, %v3787_v52  ;;  %3356 = vmatmul.mubr.msk.f32.vlgmr.msra.gmra.mxu0 %vm236_vm9, %v3797_v55  ;;  %v1148_v8 = vpop.permute.xlu0 %1147 }
 0x1f6   :  { %3359 = vmatpush3.xpose.msk.msra.mxu1 %vm236_vm9, %v1072_v7  ;;  %3364 = vmatpush3.xpose.msk.msra.mxu0 %vm236_vm9, %v1148_v8 }
 0x1f7   :  { %3360 = vmatprep.mubr.msk.f32.mxu1 %vm3663_vm8, %v3661_v45  ;;  %3365 = vmatprep.mubr.msk.f32.mxu0 %vm3663_vm8, %v3661_v45 }
 0x1f8   :  { %3368 = vmatprep.subr.mxu1 %v3661_v45  ;;  %3373 = vmatprep.subr.mxu0 %v3661_v45 }
 0x1f9   :  { %v1224_v9 = vpop.permute.xlu1 %1223  ;;  %3361 = vmatmul.mubr.msk.f32.vlgmr.msra.gmra.mxu1 %vm236_vm9, %v3795_v54  ;;  %3366 = vmatmul.mubr.msk.f32.vlgmr.msra.gmra.mxu0 %vm236_vm9, %v3805_v57  ;;  %v1300_v10 = vpop.permute.xlu0 %1299 }
 0x1fa   :  { %3369 = vmatpush3.xpose.msk.msra.mxu1 %vm236_vm9, %v1224_v9  ;;  %3374 = vmatpush3.xpose.msk.msra.mxu0 %vm236_vm9, %v1300_v10 }
 0x1fb   :  { %3370 = vmatprep.mubr.msk.f32.mxu1 %vm3663_vm8, %v3661_v45  ;;  %3375 = vmatprep.mubr.msk.f32.mxu0 %vm3663_vm8, %v3661_v45 }
 0x1fc   :  { %3378 = vmatprep.subr.mxu1 %v3661_v45  ;;  %3383 = vmatprep.subr.mxu0 %v3661_v45 }
 0x1fd   :  { %v1376_v11 = vpop.permute.xlu1 %1375  ;;  %3371 = vmatmul.mubr.msk.f32.vlgmr.msra.gmra.mxu1 %vm236_vm9, %v3803_v56  ;;  %3376 = vmatmul.mubr.msk.f32.vlgmr.msra.gmra.mxu0 %vm236_vm9, %v3811_v58 }
 0x1fe   :  { %3379 = vmatpush3.xpose.msk.msra.mxu1 %vm236_vm9, %v1376_v11  ;;  %3380 = vmatprep.mubr.msk.f32.mxu1 %vm3663_vm8, %v3661_v45 }
 0x1ff   :  { %3388 = vmatprep.subr.mxu1 %v3661_v45  ;;  %3385 = vmatprep.mubr.msk.f32.mxu0 %vm3663_vm8, %v3661_v45 }
 0x201   :  { %3381 = vmatmul.mubr.msk.f32.vlgmr.msra.gmra.mxu1 %vm236_vm9, %v3817_v59 }
 0x202   :  { %3390 = vmatprep.mubr.msk.f32.mxu1 %vm3663_vm8, %v3661_v45 }
 0x24e   :  { %v3917_v12 = vpop.f32.mrf.mxu1 }
 0x24f   :  { %v1452_v13 = vsel %vm1451_vm10, %v3917_v12, -inf }
 0x250   :  { %1453 = vmax.xlane.f32.xlu0 %v1452_v13  ;;  %v3307_v14 = vpop.f32.mrf.mxu1 }
 0x252   :  { %v3921_v15 = vpop.f32.mrf.mxu1 }
 0x253   :  { %v1455_v16 = vsel %vm1451_vm10, %v3921_v15, -inf }
 0x254   :  { %1456 = vmax.xlane.f32.xlu1 %v1455_v16  ;;  %v3312_v17 = vpop.f32.mrf.mxu1 }
 0x265   :  { %1628 = vrot.lane.b32.xlu1 %v3737_v43, %s3667_s18 }
 0x266   :  { %1704 = vrot.lane.b32.xlu0 %v3741_v44, %s3667_s18 }
 0x26a   :  { %1780 = vrot.lane.b32.xlu0 %v3767_v47, %s3667_s18 }
 0x26e   :  { %1856 = vrot.lane.b32.xlu0 %v3773_v49, %s3667_s18 }
 0x272   :  { %1932 = vrot.lane.b32.xlu0 %v3765_v46, %s3667_s18 }
 0x276   :  { %2008 = vrot.lane.b32.xlu0 %v3771_v48, %s3667_s18 }
 0x27a   :  { %2084 = vrot.lane.b32.xlu0 %v3781_v51, %s3667_s18 }
 0x27e   :  { %2160 = vrot.lane.b32.xlu0 %v3779_v50, %s3667_s18 }
 0x282   :  { %2236 = vrot.lane.b32.xlu0 %v3789_v53, %s3667_s18 }
 0x2a5   :  { %v3943_v18 = vpop.f32.mrf.mxu1 }
 0x2a6   :  { %v1458_v19 = vsel %vm1451_vm10, %v3943_v18, -inf }
 0x2a7   :  { %1459 = vmax.xlane.f32.xlu0 %v1458_v19  ;;  %v3317_v20 = vpop.f32.mrf.mxu1 }
 0x2a9   :  { %v3947_v21 = vpop.f32.mrf.mxu1  ;;  %v3949_v22 = vpop.f32.mrf.mxu0 }
 0x2aa   :  { %v1461_v23 = vsel %vm1451_vm10, %v3947_v21, -inf  ;;  %v1464_v24 = vsel %vm1451_vm10, %v3949_v22, -inf }
 0x2ab   :  { %1462 = vmax.xlane.f32.xlu0 %v1461_v23  ;;  %v3322_v25 = vpop.f32.mrf.mxu1  ;;  %1465 = vmax.xlane.f32.xlu1 %v1464_v24  ;;  %v3327_v26 = vpop.f32.mrf.mxu0 }
 0x2ad   :  { %v3955_v27 = vpop.f32.mrf.mxu1  ;;  %v3957_v28 = vpop.f32.mrf.mxu0 }
 0x2ae   :  { %v1467_v29 = vsel %vm1451_vm10, %v3955_v27, -inf  ;;  %v1470_v30 = vsel %vm1451_vm10, %v3957_v28, -inf }
 0x2af   :  { %1468 = vmax.xlane.f32.xlu0 %v1467_v29  ;;  %v3332_v31 = vpop.f32.mrf.mxu1  ;;  %1471 = vmax.xlane.f32.xlu1 %v1470_v30  ;;  %v3337_v32 = vpop.f32.mrf.mxu0 }
 0x2b1   :  { %v3963_v33 = vpop.f32.mrf.mxu1  ;;  %v3965_v34 = vpop.f32.mrf.mxu0 }
 0x2b2   :  { %v1473_v35 = vsel %vm1451_vm10, %v3963_v33, -inf  ;;  %v1476_v36 = vsel %vm1451_vm10, %v3965_v34, -inf }
 0x2b3   :  { %1474 = vmax.xlane.f32.xlu0 %v1473_v35  ;;  %v3342_v37 = vpop.f32.mrf.mxu1  ;;  %1477 = vmax.xlane.f32.xlu1 %v1476_v36  ;;  %v3347_v38 = vpop.f32.mrf.mxu0 }
 0x2b5   :  { %v3971_v39 = vpop.f32.mrf.mxu1  ;;  %v3973_v40 = vpop.f32.mrf.mxu0 }
 0x2b6   :  { %v1479_v41 = vsel %vm1451_vm10, %v3971_v39, -inf  ;;  %v1482_v42 = vsel %vm1451_vm10, %v3973_v40, -inf }
 0x2b7   :  { %1480 = vmax.xlane.f32.xlu0 %v1479_v41  ;;  %v3352_v43 = vpop.f32.mrf.mxu1  ;;  %1483 = vmax.xlane.f32.xlu1 %v1482_v42  ;;  %v3357_v44 = vpop.f32.mrf.mxu0 }
 0x2b9   :  { %v3979_v46 = vpop.f32.mrf.mxu1  ;;  %v3981_v47 = vpop.f32.mrf.mxu0 }
 0x2ba   :  { %v1485_v48 = vsel %vm1451_vm10, %v3979_v46, -inf  ;;  %v1488_v49 = vsel %vm1451_vm10, %v3981_v47, -inf }
 0x2bb   :  { %1486 = vmax.xlane.f32.xlu0 %v1485_v48  ;;  %v3362_v50 = vpop.f32.mrf.mxu1  ;;  %1489 = vmax.xlane.f32.xlu1 %v1488_v49  ;;  %v3367_v51 = vpop.f32.mrf.mxu0 }
 0x2bd   :  { %v3987_v53 = vpop.f32.mrf.mxu1  ;;  %v3989_v60 = vpop.f32.mrf.mxu0 }
 0x2be   :  { %v1494_v61 = vsel %vm1451_vm10, %v3989_v60, -inf }
 0x2bf   :  { %v3372_v62 = vpop.f32.mrf.mxu1  ;;  %1495 = vmax.xlane.f32.xlu1 %v1494_v61  ;;  %v3377_v63 = vpop.f32.mrf.mxu0 }
 0x2c1   :  { %v3993_v0 = vpop.f32.mrf.mxu1 }
 0x2c2   :  { %v1497_v8 = vsel %vm1451_vm10, %v3993_v0, -inf }
 0x2c3   :  { %v3382_v1 = vpop.f32.mrf.mxu1 }
 0x2d0   :  { %2312 = vrot.lane.b32.xlu1 %v3787_v52, %s3667_s18 }
 0x2d1   :  { %2388 = vrot.lane.b32.xlu0 %v3797_v55, %s3667_s18  ;;  %v1491_v55 = vsel %vm1451_vm10, %v3987_v53, -inf }
 0x2d5   :  { %2464 = vrot.lane.b32.xlu0 %v3795_v54, %s3667_s18 }
 0x2d9   :  { %v1454_v2 = vpop.xlane.xlu0 %1453 }
 0x2da   :  { %v1500_v3 = vsub.f32 %v3917_v12, %v1454_v2 }
 0x2dc   :  { %v1516_v6 = vmul.f32 1.442695, %v1500_v3 }
 0x2dd   :  { %v1457_v4 = vpop.xlane.xlu1 %1456  ;;  %v1705_v5 = vpop.permute.xlu0 %1704 }
 0x2de   :  { %3389 = vmatpush3.msra.mxu1 %v1705_v5  ;;  %3500 = vpow2.f32 %v1516_v6  ;;  %v1501_v12 = vsub.f32 %v3921_v15, %v1457_v4 }
 0x2df   :  { %3398 = vmatprep.subr.mxu1 %v3661_v45 }
 0x2e0   :  { %v1518_v14 = vmul.f32 1.442695, %v1501_v12 }
 0x2e1   :  { %v1629_v7 = vpop.permute.xlu1 %1628  ;;  %v4012_v9 = vpop.permute.xlu0 %1780 }
 0x2e2   :  { %3384 = vmatpush3.msra.mxu0 %v1629_v7  ;;  %3502 = vpow2.f32 %v1518_v14 }
 0x2e3   :  { %3393 = vmatprep.subr.mxu0 %v3661_v45 }
 0x2e5   :  { %v4014_v10 = vpop.permute.xlu0 %1856 }
 0x2e9   :  { %v4020_v11 = vpop.permute.xlu0 %1932 }
 0x2eb   :  { %v4004_v52 = vpop.eup %3500 }
 0x2ec   :  { %v1548_v54 = vsel %vm1451_vm10, %v4004_v52, 0.0 }
 0x2ed   :  { %v4023_v13 = vpop.permute.xlu0 %2008 }
 0x2ef   :  { %v4031_v20 = vpop.eup %3502 }
 0x2f1   :  { %v4025_v16 = vpop.permute.xlu0 %2084 }
 0x2f4   :  { %1492 = vmax.xlane.f32.xlu0 %v1491_v55  ;;  %1549 = vadd.xlane.f32.xlu1 %v1548_v54 }
 0x2f5   :  { %v4027_v17 = vpop.permute.xlu0 %2160 }
 0x2f8   :  { %1498 = vmax.xlane.f32.xlu0 %v1497_v8 }
 0x2f9   :  { %v4029_v19 = vpop.permute.xlu0 %2236 }
 0x30e   :  { %2540 = vrot.lane.b32.xlu0 %v3805_v57, %s3667_s18 }
 0x312   :  { %2616 = vrot.lane.b32.xlu0 %v3803_v56, %s3667_s18  ;;  %v1551_v56 = vsel %vm1451_vm10, %v4031_v20, 0.0 }
 0x330   :  { %v1460_v57 = vpop.xlane.xlu0 %1459 }
 0x331   :  { %v1502_v23 = vsub.f32 %v3943_v18, %v1460_v57  ;;  %1552 = vadd.xlane.f32.xlu0 %v1551_v56 }
 0x333   :  { %v1520_v15 = vmul.f32 1.442695, %v1502_v23 }
 0x334   :  { %v1466_v24 = vpop.xlane.xlu1 %1465  ;;  %v1463_v25 = vpop.xlane.xlu0 %1462 }
 0x335   :  { %3504 = vpow2.f32 %v1520_v15  ;;  %v1504_v26 = vsub.f32 %v3949_v22, %v1466_v24  ;;  %v1503_v29 = vsub.f32 %v3947_v21, %v1463_v25 }
 0x337   :  { %v1524_v30 = vmul.f32 1.442695, %v1504_v26  ;;  %v1522_v31 = vmul.f32 1.442695, %v1503_v29 }
 0x338   :  { %v1472_v32 = vpop.xlane.xlu1 %1471  ;;  %v1469_v35 = vpop.xlane.xlu0 %1468 }
 0x339   :  { %3506 = vpow2.f32 %v1524_v30  ;;  %v1506_v36 = vsub.f32 %v3957_v28, %v1472_v32  ;;  %v1505_v37 = vsub.f32 %v3955_v27, %v1469_v35 }
 0x33a   :  { %3508 = vpow2.f32 %v1522_v31 }
 0x33b   :  { %v1528_v18 = vmul.f32 1.442695, %v1506_v36  ;;  %v1526_v38 = vmul.f32 1.442695, %v1505_v37 }
 0x33c   :  { %v1478_v41 = vpop.xlane.xlu1 %1477  ;;  %v1475_v42 = vpop.xlane.xlu0 %1474 }
 0x33d   :  { %3510 = vpow2.f32 %v1528_v18  ;;  %v1508_v43 = vsub.f32 %v3965_v34, %v1478_v41  ;;  %v1507_v22 = vsub.f32 %v3963_v33, %v1475_v42 }
 0x33e   :  { %3512 = vpow2.f32 %v1526_v38 }
 0x33f   :  { %v1532_v21 = vmul.f32 1.442695, %v1508_v43  ;;  %v1530_v44 = vmul.f32 1.442695, %v1507_v22 }
 0x340   :  { %v1484_v48 = vpop.xlane.xlu1 %1483  ;;  %v1481_v49 = vpop.xlane.xlu0 %1480 }
 0x341   :  { %3514 = vpow2.f32 %v1532_v21  ;;  %v1510_v28 = vsub.f32 %v3973_v40, %v1484_v48  ;;  %v1509_v27 = vsub.f32 %v3971_v39, %v1481_v49 }
 0x342   :  { %v4044_v50 = vpop.eup %3504  ;;  %3516 = vpow2.f32 %v1530_v44 }
 0x343   :  { %v1536_v51 = vmul.f32 1.442695, %v1510_v28  ;;  %v1534_v61 = vmul.f32 1.442695, %v1509_v27  ;;  %v1554_v34 = vsel %vm1451_vm10, %v4044_v50, 0.0 }
 0x344   :  { %v1490_v62 = vpop.xlane.xlu1 %1489  ;;  %1555 = vadd.xlane.f32.xlu1 %v1554_v34  ;;  %v1487_v33 = vpop.xlane.xlu0 %1486 }
 0x345   :  { %3518 = vpow2.f32 %v1536_v51  ;;  %v1512_v63 = vsub.f32 %v3981_v47, %v1490_v62  ;;  %v1511_v1 = vsub.f32 %v3979_v46, %v1487_v33 }
 0x346   :  { %v4050_v2 = vpop.eup %3506  ;;  %3520 = vpow2.f32 %v1534_v61 }
 0x347   :  { %v4052_v39 = vpop.eup %3508  ;;  %v1540_v40 = vmul.f32 1.442695, %v1512_v63  ;;  %v1538_v3 = vmul.f32 1.442695, %v1511_v1  ;;  %v1560_v4 = vsel %vm1451_vm10, %v4050_v2, 0.0 }
 0x348   :  { %v1496_v5 = vpop.xlane.xlu1 %1495  ;;  %1561 = vadd.xlane.f32.xlu1 %v1560_v4  ;;  %v1557_v6 = vsel %vm1451_vm10, %v4052_v39, 0.0  ;;  %v4095_v35 = vpop.permute.xlu0 %2388 }
 0x349   :  { %3522 = vpow2.f32 %v1540_v40  ;;  %v1514_v47 = vsub.f32 %v3989_v60, %v1496_v5  ;;  %1558 = vadd.xlane.f32.xlu0 %v1557_v6 }
 0x34a   :  { %v4059_v46 = vpop.eup %3510  ;;  %3524 = vpow2.f32 %v1538_v3 }
 0x34b   :  { %v4061_v7 = vpop.eup %3512  ;;  %v1544_v55 = vmul.f32 1.442695, %v1514_v47  ;;  %v1566_v54 = vsel %vm1451_vm10, %v4059_v46, 0.0 }
 0x34c   :  { %1567 = vadd.xlane.f32.xlu1 %v1566_v54  ;;  %v1563_v8 = vsel %vm1451_vm10, %v4061_v7, 0.0  ;;  %v4097_v36 = vpop.permute.xlu1 %2312  ;;  %v4099_v37 = vpop.permute.xlu0 %2464 }
 0x34d   :  { %3526 = vpow2.f32 %v1544_v55  ;;  %1564 = vadd.xlane.f32.xlu0 %v1563_v8 }
 0x34e   :  { %v4067_v12 = vpop.eup %3514 }
 0x34f   :  { %v4069_v14 = vpop.eup %3516  ;;  %v1572_v60 = vsel %vm1451_vm10, %v4067_v12, 0.0 }
 0x350   :  { %1573 = vadd.xlane.f32.xlu1 %v1572_v60  ;;  %v1569_v57 = vsel %vm1451_vm10, %v4069_v14, 0.0 }
 0x351   :  { %1570 = vadd.xlane.f32.xlu0 %v1569_v57 }
 0x352   :  { %v4075_v56 = vpop.eup %3518 }
 0x353   :  { %v4077_v23 = vpop.eup %3520  ;;  %v1578_v15 = vsel %vm1451_vm10, %v4075_v56, 0.0 }
 0x354   :  { %1579 = vadd.xlane.f32.xlu1 %v1578_v15  ;;  %v1575_v24 = vsel %vm1451_vm10, %v4077_v23, 0.0 }
 0x355   :  { %1576 = vadd.xlane.f32.xlu0 %v1575_v24 }
 0x356   :  { %v4083_v25 = vpop.eup %3522 }
 0x357   :  { %v4085_v26 = vpop.eup %3524  ;;  %v1584_v29 = vsel %vm1451_vm10, %v4083_v25, 0.0 }
 0x358   :  { %1585 = vadd.xlane.f32.xlu1 %v1584_v29  ;;  %v1581_v30 = vsel %vm1451_vm10, %v4085_v26, 0.0 }
 0x359   :  { %1582 = vadd.xlane.f32.xlu0 %v1581_v30 }
 0x35a   :  { %v4091_v31 = vpop.eup %3526 }
 0x35b   :  { %v1590_v32 = vsel %vm1451_vm10, %v4091_v31, 0.0 }
 0x35d   :  { %1591 = vadd.xlane.f32.xlu0 %v1590_v32 }
 0x37d   :  { %v1550_v18 = vpop.xlane.xlu1 %1549  ;;  %v1493_v38 = vpop.xlane.xlu0 %1492 }
 0x37e   :  { %3528 = vrcp.f32 %v1550_v18  ;;  %v1513_v41 = vsub.f32 %v3987_v53, %v1493_v38 }
 0x380   :  { %v1542_v42 = vmul.f32 1.442695, %v1513_v41 }
 0x381   :  { %v1499_v43 = vpop.xlane.xlu0 %1498 }
 0x382   :  { %3530 = vpow2.f32 %v1542_v42  ;;  %v1515_v22 = vsub.f32 %v3993_v0, %v1499_v43 }
 0x384   :  { %v1546_v21 = vmul.f32 1.442695, %v1515_v22 }
 0x386   :  { %3532 = vpow2.f32 %v1546_v21 }
 0x38b   :  { %v3529_v44 = vpop.eup %3528 }
 0x38c   :  { %v1612_v48 = vmul.f32 %v3529_v44, %v4004_v52 }
 0x38e   :  { %3386 = vmatmul.mubr.msk.f32.vlgmr.msra.gmra.mxu0 %vm1451_vm10, %v1612_v48 }
 0x38f   :  { %v4105_v49 = vpop.eup %3530  ;;  %3394 = vmatpush3.msra.mxu0 %v4012_v9  ;;  %3395 = vmatprep.mubr.msk.f32.mxu0 %vm3663_vm8, %v3661_v45  ;;  %v4121_v9 = vpop.permute.xlu0 %2540 }
 0x390   :  { %v1587_v53 = vsel %vm1451_vm10, %v4105_v49, 0.0  ;;  %3403 = vmatprep.subr.mxu0 %v3661_v45 }
 0x391   :  { %1588 = vadd.xlane.f32.xlu0 %v1587_v53 }
 0x393   :  { %v4113_v0 = vpop.eup %3532  ;;  %v4123_v28 = vpop.permute.xlu0 %2616 }
 0x394   :  { %v1593_v52 = vsel %vm1451_vm10, %v4113_v0, 0.0 }
 0x395   :  { %1594 = vadd.xlane.f32.xlu1 %v1593_v52 }
 0x3a6   :  { %2692 = vrot.lane.b32.xlu1 %v3811_v58, %s3667_s18 }
 0x3a7   :  { %2768 = vrot.lane.b32.xlu0 %v3817_v59, %s3667_s18 }
 0x3ba   :  { %v1553_v27 = vpop.xlane.xlu0 %1552 }
 0x3bb   :  { %3534 = vrcp.f32 %v1553_v27 }
 0x3c8   :  { %v3535_v51 = vpop.eup %3534 }
 0x3c9   :  { %v1613_v61 = vmul.f32 %v3535_v51, %v4031_v20 }
 0x3cb   :  { %3391 = vmatmul.mubr.msk.f32.vlgmr.msra.gmra.mxu1 %vm1451_vm10, %v1613_v61 }
 0x3cc   :  { %3399 = vmatpush3.msra.mxu1 %v4014_v10  ;;  %3400 = vmatprep.mubr.msk.f32.mxu1 %vm3663_vm8, %v3661_v45 }
 0x3cd   :  { %v1556_v58 = vpop.xlane.xlu1 %1555  ;;  %3408 = vmatprep.subr.mxu1 %v3661_v45 }
 0x3ce   :  { %3536 = vrcp.f32 %v1556_v58 }
 0x3d1   :  { %v1562_v59 = vpop.xlane.xlu1 %1561 }
 0x3d2   :  { %3538 = vrcp.f32 %v1562_v59  ;;  %v1559_v34 = vpop.xlane.xlu0 %1558 }
 0x3d3   :  { %3540 = vrcp.f32 %v1559_v34 }
 0x3d5   :  { %v1568_v62 = vpop.xlane.xlu1 %1567 }
 0x3d6   :  { %3542 = vrcp.f32 %v1568_v62  ;;  %v1565_v33 = vpop.xlane.xlu0 %1564 }
 0x3d7   :  { %3544 = vrcp.f32 %v1565_v33 }
 0x3d9   :  { %v1574_v20 = vpop.xlane.xlu1 %1573 }
 0x3da   :  { %3546 = vrcp.f32 %v1574_v20  ;;  %v1571_v63 = vpop.xlane.xlu0 %1570 }
 0x3db   :  { %v3537_v1 = vpop.eup %3536  ;;  %3548 = vrcp.f32 %v1571_v63  ;;  %v2922_v63 = vld [vmem:[#allocation7 + $0x18] sm:$0xff] }
 0x3dc   :  { %v1614_v10 = vmul.f32 %v3537_v1, %v4044_v50  ;;  %v2921_v1 = vld [vmem:[#allocation7 + $0x10] sm:$0xff] }
 0x3dd   :  { %v1580_v40 = vpop.xlane.xlu1 %1579 }
 0x3de   :  { %3550 = vrcp.f32 %v1580_v40  ;;  %v1577_v3 = vpop.xlane.xlu0 %1576  ;;  %3396 = vmatmul.mubr.msk.f32.vlgmr.msra.gmra.mxu0 %vm1451_vm10, %v1614_v10  ;;  %v2920_v10 = vld [vmem:[#allocation7 + $0x8] sm:$0xff]  ;;  %v2919_v40 = vld [vmem:[#allocation7] sm:$0xff] }
 0x3df   :  { %v3539_v4 = vpop.eup %3538  ;;  %3552 = vrcp.f32 %v1577_v3  ;;  %3404 = vmatpush3.msra.mxu0 %v4020_v11  ;;  %3405 = vmatprep.mubr.msk.f32.mxu0 %vm3663_vm8, %v3661_v45 }
 0x3e0   :  { %v3541_v5 = vpop.eup %3540  ;;  %3413 = vmatprep.subr.mxu0 %v3661_v45  ;;  %v1616_v6 = vmul.f32 %v3539_v4, %v4050_v2 }
 0x3e1   :  { %v1586_v47 = vpop.xlane.xlu1 %1585  ;;  %v1615_v50 = vmul.f32 %v3541_v5, %v4052_v39 }
 0x3e2   :  { %3554 = vrcp.f32 %v1586_v47  ;;  %v1583_v55 = vpop.xlane.xlu0 %1582  ;;  %3406 = vmatmul.mubr.msk.f32.vlgmr.msra.gmra.mxu0 %vm1451_vm10, %v1616_v6 }
 0x3e3   :  { %v3543_v54 = vpop.eup %3542  ;;  %3556 = vrcp.f32 %v1583_v55  ;;  %3401 = vmatmul.mubr.msk.f32.vlgmr.msra.gmra.mxu1 %vm1451_vm10, %v1615_v50  ;;  %3414 = vmatpush3.msra.mxu0 %v4025_v16 }
 0x3e4   :  { %v3545_v11 = vpop.eup %3544  ;;  %3409 = vmatpush3.msra.mxu1 %v4023_v13  ;;  %3410 = vmatprep.mubr.msk.f32.mxu1 %vm3663_vm8, %v3661_v45  ;;  %v1618_v2 = vmul.f32 %v3543_v54, %v4059_v46 }
 0x3e5   :  { %3415 = vmatprep.mubr.msk.f32.mxu0 %vm3663_vm8, %v3661_v45  ;;  %3418 = vmatprep.subr.mxu1 %v3661_v45  ;;  %v1617_v39 = vmul.f32 %v3545_v11, %v4061_v7 }
 0x3e6   :  { %3423 = vmatprep.subr.mxu0 %v3661_v45  ;;  %3416 = vmatmul.mubr.msk.f32.vlgmr.msra.gmra.mxu0 %vm1451_vm10, %v1618_v2 }
 0x3e7   :  { %v3547_v16 = vpop.eup %3546  ;;  %3411 = vmatmul.mubr.msk.f32.vlgmr.msra.gmra.mxu1 %vm1451_vm10, %v1617_v39  ;;  %3424 = vmatpush3.msra.mxu0 %v4029_v19 }
 0x3e8   :  { %v3549_v13 = vpop.eup %3548  ;;  %3419 = vmatpush3.msra.mxu1 %v4027_v17  ;;  %3420 = vmatprep.mubr.msk.f32.mxu1 %vm3663_vm8, %v3661_v45  ;;  %v1620_v46 = vmul.f32 %v3547_v16, %v4067_v12 }
 0x3e9   :  { %3425 = vmatprep.mubr.msk.f32.mxu0 %vm3663_vm8, %v3661_v45  ;;  %3428 = vmatprep.subr.mxu1 %v3661_v45  ;;  %v1619_v7 = vmul.f32 %v3549_v13, %v4069_v14 }
 0x3ea   :  { %3433 = vmatprep.subr.mxu0 %v3661_v45  ;;  %3426 = vmatmul.mubr.msk.f32.vlgmr.msra.gmra.mxu0 %vm1451_vm10, %v1620_v46 }
 0x3eb   :  { %v3551_v19 = vpop.eup %3550  ;;  %3421 = vmatmul.mubr.msk.f32.vlgmr.msra.gmra.mxu1 %vm1451_vm10, %v1619_v7  ;;  %3434 = vmatpush3.msra.mxu0 %v4095_v35 }
 0x3ec   :  { %v3553_v17 = vpop.eup %3552  ;;  %3429 = vmatpush3.msra.mxu1 %v4097_v36  ;;  %3430 = vmatprep.mubr.msk.f32.mxu1 %vm3663_vm8, %v3661_v45  ;;  %v1622_v8 = vmul.f32 %v3551_v19, %v4075_v56 }
 0x3ed   :  { %3435 = vmatprep.mubr.msk.f32.mxu0 %vm3663_vm8, %v3661_v45  ;;  %3438 = vmatprep.subr.mxu1 %v3661_v45  ;;  %v1621_v12 = vmul.f32 %v3553_v17, %v4077_v23  ;;  %v1592_v23 = vpop.xlane.xlu0 %1591 }
 0x3ee   :  { %3443 = vmatprep.subr.mxu0 %v3661_v45  ;;  %3436 = vmatmul.mubr.msk.f32.vlgmr.msra.gmra.mxu0 %vm1451_vm10, %v1622_v8  ;;  %3558 = vrcp.f32 %v1592_v23 }
 0x3ef   :  { %v3555_v14 = vpop.eup %3554  ;;  %3431 = vmatmul.mubr.msk.f32.vlgmr.msra.gmra.mxu1 %vm1451_vm10, %v1621_v12  ;;  %3444 = vmatpush3.msra.mxu0 %v4121_v9 }
 0x3f0   :  { %v3557_v60 = vpop.eup %3556  ;;  %3439 = vmatpush3.msra.mxu1 %v4099_v37  ;;  %3440 = vmatprep.mubr.msk.f32.mxu1 %vm3663_vm8, %v3661_v45  ;;  %v1624_v57 = vmul.f32 %v3555_v14, %v4083_v25 }
 0x3f1   :  { %3445 = vmatprep.mubr.msk.f32.mxu0 %vm3663_vm8, %v3661_v45  ;;  %3448 = vmatprep.subr.mxu1 %v3661_v45  ;;  %v1623_v56 = vmul.f32 %v3557_v60, %v4085_v26 }
 0x3f2   :  { %3446 = vmatmul.mubr.msk.f32.vlgmr.msra.gmra.mxu0 %vm1451_vm10, %v1624_v57  ;;  %3453 = vmatprep.subr.mxu0 %v3661_v45 }
 0x3f3   :  { %3441 = vmatmul.mubr.msk.f32.vlgmr.msra.gmra.mxu1 %vm1451_vm10, %v1623_v56  ;;  %3455 = vmatprep.mubr.msk.f32.mxu0 %vm3663_vm8, %v3661_v45 }
 0x3f4   :  { %3449 = vmatpush3.msra.mxu1 %v4123_v28  ;;  %3450 = vmatprep.mubr.msk.f32.mxu1 %vm3663_vm8, %v3661_v45 }
 0x3f5   :  { %3458 = vmatprep.subr.mxu1 %v3661_v45 }
 0x3fb   :  { %v3559_v25 = vpop.eup %3558 }
 0x3fc   :  { %v1626_v29 = vmul.f32 %v3559_v25, %v4091_v31 }
 0x41a   :  { %v1589_v15 = vpop.xlane.xlu0 %1588 }
 0x41b   :  { %3560 = vrcp.f32 %v1589_v15 }
 0x41e   :  { %v1595_v24 = vpop.xlane.xlu1 %1594  ;;  %v2769_v35 = vpop.permute.xlu0 %2768 }
 0x41f   :  { %3562 = vrcp.f32 %v1595_v24 }
 0x422   :  { %v2693_v26 = vpop.permute.xlu1 %2692 }
 0x423   :  { %3454 = vmatpush3.msra.mxu0 %v2693_v26 }
 0x424   :  { %3456 = vmatmul.mubr.msk.f32.vlgmr.msra.gmra.mxu0 %vm1451_vm10, %v1626_v29  ;;  %3463 = vmatprep.subr.mxu0 %v2922_v63 }
 0x425   :  { %3464 = vmatpush3.msra.mxu0 %v2922_v63 }
 0x426   :  { %3465 = vmatprep.subr.mxu0 %v2921_v1 }
 0x427   :  { %3466 = vmatpush3.msra.mxu0 %v2921_v1 }
 0x428   :  { %v3561_v30 = vpop.eup %3560  ;;  %3467 = vmatprep.subr.mxu0 %v2920_v10 }
 0x429   :  { %v1625_v32 = vmul.f32 %v3561_v30, %v4105_v49  ;;  %3468 = vmatpush3.msra.mxu0 %v2920_v10 }
 0x42a   :  { %3469 = vmatprep.subr.mxu0 %v2919_v40 }
 0x42b   :  { %3451 = vmatmul.mubr.msk.f32.vlgmr.msra.gmra.mxu1 %vm1451_vm10, %v1625_v32  ;;  %3470 = vmatpush3.msra.mxu0 %v2919_v40 }
 0x42c   :  { %v3563_v36 = vpop.eup %3562  ;;  %3459 = vmatpush3.msra.mxu1 %v2769_v35  ;;  %3460 = vmatprep.mubr.msk.f32.mxu1 %vm3663_vm8, %v3661_v45 }
 0x42d   :  { %v1627_v37 = vmul.f32 %v3563_v36, %v4113_v0 }
 0x42f   :  { %3461 = vmatmul.mubr.msk.f32.vlgmr.msra.gmra.mxu1 %vm1451_vm10, %v1627_v37 }
 0x44e   :  { %v4203_v18 = vpop.f32.mrf.mxu0 }
 0x450   :  { %v3387_v31 = vpop.f32.mrf.mxu0 }
 0x48b   :  { %v4205_v38 = vpop.f32.mrf.mxu1 }
 0x48d   :  { %v3392_v41 = vpop.f32.mrf.mxu1 }
 0x48e   :  { %v3016_v41 = vlaneseq }
 0x49e   :  { %v1852_v42 = vpop.f32.mrf.mxu0 }
 0x49f   :  { %2846 = vrot.lane.b32.xlu1 %v1852_v42, %s3668_s19 }
 0x4a0   :  { %v3397_v43 = vpop.f32.mrf.mxu0 }
 0x4a1   :  { %v3017_v43 = vshrl.u32 %v3016_v41, 7 }
 0x4a2   :  { %v2004_v22 = vpop.f32.mrf.mxu0 }
 0x4a3   :  { %v1928_v21 = vpop.f32.mrf.mxu1  ;;  %2854 = vrot.lane.b32.xlu1 %v2004_v22, %s3652_s22 }
 0x4a4   :  { %2848 = vrot.lane.b32.xlu0 %v1928_v21, %s3668_s19  ;;  %v3407_v45 = vpop.f32.mrf.mxu0 }
 0x4a5   :  { %v3402_v44 = vpop.f32.mrf.mxu1 }
 0x4a6   :  { %v2156_v48 = vpop.f32.mrf.mxu0 }
 0x4a7   :  { %v2080_v49 = vpop.f32.mrf.mxu1  ;;  %2862 = vrot.lane.b32.xlu1 %v2156_v48, %s3669_s20 }
 0x4a8   :  { %2856 = vrot.lane.b32.xlu0 %v2080_v49, %s3652_s22  ;;  %v3417_v53 = vpop.f32.mrf.mxu0  ;;  %s3673_s22 = smov 28  }
 0x4a9   :  { %v3412_v0 = vpop.f32.mrf.mxu1 }
 0x4aa   :  { %v2308_v52 = vpop.f32.mrf.mxu0 }
 0x4ab   :  { %v2232_v9 = vpop.f32.mrf.mxu1  ;;  %2870 = vrot.lane.b32.xlu1 %v2308_v52, %s3670_s21 }
 0x4ac   :  { %2864 = vrot.lane.b32.xlu0 %v2232_v9, %s3669_s20  ;;  %v3427_v28 = vpop.f32.mrf.mxu0 }
 0x4ad   :  { %v3422_v27 = vpop.f32.mrf.mxu1 }
 0x4ae   :  { %v2460_v51 = vpop.f32.mrf.mxu0 }
 0x4af   :  { %v2384_v61 = vpop.f32.mrf.mxu1  ;;  %2878 = vrot.lane.b32.xlu1 %v2460_v51, %s3671_s23 }
 0x4b0   :  { %2872 = vrot.lane.b32.xlu0 %v2384_v61, %s3670_s21  ;;  %v3437_v58 = vpop.f32.mrf.mxu0 }
 0x4b1   :  { %v3432_v59 = vpop.f32.mrf.mxu1 }
 0x4b2   :  { %v2612_v34 = vpop.f32.mrf.mxu0 }
 0x4b3   :  { %v2536_v62 = vpop.f32.mrf.mxu1  ;;  %2886 = vrot.lane.b32.xlu1 %v2612_v34, %s3672_s24 }
 0x4b4   :  { %2880 = vrot.lane.b32.xlu0 %v2536_v62, %s3671_s23  ;;  %v3447_v33 = vpop.f32.mrf.mxu0 }
 0x4b5   :  { %v3442_v20 = vpop.f32.mrf.mxu1 }
 0x4e4   :  { %v2764_v3 = vpop.f32.mrf.mxu0 }
 0x4e5   :  { %2894 = vrot.lane.b32.xlu1 %v2764_v3, %s3673_s22 }
 0x4e6   :  { %v3457_v4 = vpop.f32.mrf.mxu0 }
 0x4eb   :  { %v2688_v5 = vpop.f32.mrf.mxu1 }
 0x4ec   :  { %2888 = vrot.lane.b32.xlu0 %v2688_v5, %s3672_s24 }
 0x4ed   :  { %v3452_v6 = vpop.f32.mrf.mxu1 }
 0x4ef   :  { %v2840_v47 = vpop.f32.mrf.mxu1 }
 0x4f0   :  { %2896 = vrot.lane.b32.xlu0 %v2840_v47, %s3673_s22 }
 0x4f1   :  { %v3462_v50 = vpop.f32.mrf.mxu1 }
 0x511   :  { %v2847_v55 = vpop.permute.xlu1 %2846 }
 0x512   :  { %v2900_v7 = vsel %vm236_vm9, %v4203_v18, %v2847_v55  ;;  %v3674_v18 = vmov 1966171168  }
 0x513   :  { %v3014_v31 = vunpack.c.l.s4 %v3674_v18 }
 0x515   :  { %v2855_v54 = vpop.permute.xlu1 %2854  ;;  %v3015_v42 = vunpack.c.0.s8 %v3014_v31 }
 0x516   :  { %v2849_v2 = vpop.permute.xlu0 %2848  ;;  %v2902_v19 = vsel %vm1451_vm10, %v2900_v7, %v2855_v54 }
 0x517   :  { %v2901_v24 = vsel %vm236_vm9, %v4205_v38, %v2849_v2  ;;  %v3213_v38 = vld [vmem:[%s4252_s4] ss:$0 sm:$0xff]  ;;  %v3018_v22 = vsub.s32 %v3015_v42, %v3017_v43  ;;  %s3675_s4 = smov [#allocation8]  }
 0x518   :  { %s3149_s27 = sshll.u32 %s3675_s4, 4  ;;  %s3150_s27 = int_to_ptr.vmem [resolvable:$true] %s3149_s27 }
 0x519   :  { %v2863_v11 = vpop.permute.xlu1 %2862  ;;  %s3624_s30 = scalar_lea.vmem %s3150_s27, 256  ;;  %p3629_p2 = scmp.lt.s32.totalorder %s3150_s27, %s3150_s27 }
 0x51a   :  { %v2857_v16 = vpop.permute.xlu0 %2856  ;;  %v2905_v8 = vsel %vm2904_vm11, %v2902_v19, %v2863_v11  ;;  %p3625_p1 = scmp.ne.s32.totalorder %s3150_s27, %s3624_s30  ;;  %p3630_p3 = scmp.lt.s32.totalorder %s3624_s30, %s3624_s30 }
 0x51b   :  { %v2903_v25 = vsel %vm1451_vm10, %v2901_v24, %v2857_v16 }
 0x51c   :  { %p3631_p4 = por %p3630_p3, %p3629_p2 }
 0x51d   :  { %v2871_v39 = vpop.permute.xlu1 %2870 }
 0x51e   :  { %v2865_v46 = vpop.permute.xlu0 %2864  ;;  %v2908_v14 = vsel %vm2907_vm12, %v2905_v8, %v2871_v39  ;;  %p3632_p5 = pnand %p3631_p4, %p3625_p1 }
 0x51f   :  { %v2906_v29 = vsel %vm2904_vm11, %v2903_v25, %v2865_v46 }
 0x521   :  { %v2879_v13 = vpop.permute.xlu1 %2878 }
 0x522   :  { %v2873_v12 = vpop.permute.xlu0 %2872  ;;  %v2911_v60 = vsel %vm2910_vm13, %v2908_v14, %v2879_v13 }
 0x523   :  { %v2909_v30 = vsel %vm2907_vm12, %v2906_v29, %v2873_v12 }
 0x525   :  { %v2887_v17 = vpop.permute.xlu1 %2886 }
 0x526   :  { %v2914_v57 = vsel %vm2913_vm14, %v2911_v60, %v2887_v17  ;;  %v2881_v15 = vpop.permute.xlu0 %2880 }
 0x527   :  { %v2912_v32 = vsel %vm2910_vm13, %v2909_v30, %v2881_v15 }
 0x557   :  { %v2895_v56 = vpop.permute.xlu1 %2894 }
 0x558   :  { %v2917_v23 = vsel %vm2916_vm15, %v2914_v57, %v2895_v56 }
 0x559   :  { %3471 = vmatprep.mubr.msk.f32.mxu0 %vm124_vm7, %v2917_v23 }
 0x55e   :  { %v2889_v26 = vpop.permute.xlu0 %2888 }
 0x55f   :  { %v2915_v35 = vsel %vm2913_vm14, %v2912_v32, %v2889_v26 }
 0x562   :  { %v2897_v36 = vpop.permute.xlu0 %2896 }
 0x563   :  { %v2918_v37 = vsel %vm2916_vm15, %v2915_v35, %v2897_v36 }
 0x564   :  { %3472 = vmatmul.mubr.msk.f32.vlgmr.msra.gmra.mxu0 %vm124_vm7, %v2918_v37 }
 0x624   :  { %v3473_v21 = vpop.f32.mrf.mxu0 }
 0x625   :  { %v3008_v45 = vadd.f32 %v3473_v21, %v3213_v38 }
 0x626   :  { %v3002_v44 = vpop.f32.mrf.mxu0 }
 0x627   :  { %v3079_v48 = vcombine.high %v3008_v45, %v3008_v45  ;;  %v3086_v49 = vrot.slane %v3008_v45, %v3018_v22  ;;  %v3003_v53 = vadd.f32 %v3213_v38, %v3002_v44 }
 0x629   :  { %v3093_v0 = vrot.slane %v3079_v48, %v3018_v22  ;;  %v3094_v52 = vcombine.high %v3086_v49, %v3086_v49  ;;  %v3102_v9 = vrot.slane %v3086_v49, %v3018_v22  ;;  %v3012_v28 = vcombine.high %v3003_v53, %v3003_v53 }
 0x62a   :  { %v3019_v27 = vrot.slane %v3003_v53, %v3018_v22 }
 0x62b   :  { %v3095_v51 = vcombine.high %v3093_v0, %v3093_v0  ;;  %v3109_v61 = vrot.slane %v3093_v0, %v3018_v22  ;;  %v3116_v58 = vrot.slane %v3094_v52, %v3018_v22  ;;  %v3124_v59 = vcombine.high %v3102_v9, %v3102_v9  ;;  %3136 = vst.msk [vmem:[#allocation8 + $0x1] sm:$0x1] %vm3069_vm0, %v3102_v9 }
 0x62c   :  { %v3026_v34 = vrot.slane %v3012_v28, %v3018_v22  ;;  %v3027_v62 = vcombine.high %v3019_v27, %v3019_v27  ;;  %v3035_v33 = vrot.slane %v3019_v27, %v3018_v22 }
 0x62d   :  { %v3123_v20 = vrot.slane %v3095_v51, %v3018_v22  ;;  %v3125_v63 = vcombine.high %v3109_v61, %v3109_v61  ;;  %v3126_v1 = vcombine.high %v3116_v58, %v3116_v58  ;;  %3137 = vst.msk [vmem:[#allocation8 + $0x3] sm:$0x1] %vm3069_vm0, %v3116_v58  ;;  %3138 = vst.msk [vmem:[#allocation8 + $0x5] sm:$0x1] %vm3069_vm0, %v3124_v59 }
 0x62e   :  { %3140 = vst.msk [vmem:[#allocation8 + $0x9] sm:$0x1] %vm3069_vm0, %v3109_v61  ;;  %v3028_v10 = vcombine.high %v3026_v34, %v3026_v34  ;;  %v3042_v40 = vrot.slane %v3026_v34, %v3018_v22  ;;  %v3049_v3 = vrot.slane %v3027_v62, %v3018_v22  ;;  %v3057_v4 = vcombine.high %v3035_v33, %v3035_v33 }
 0x62f   :  { %3070 = vst.msk [vmem:[#allocation8] sm:$0x1] %vm3069_vm0, %v3035_v33  ;;  %v3127_v5 = vcombine.high %v3123_v20, %v3123_v20  ;;  %3139 = vst.msk [vmem:[#allocation8 + $0x7] sm:$0x1] %vm3069_vm0, %v3126_v1 }
 0x630   :  { %3141 = vst.msk [vmem:[#allocation8 + $0xb] sm:$0x1] %vm3069_vm0, %v3123_v20  ;;  %3142 = vst.msk [vmem:[#allocation8 + $0xd] sm:$0x1] %vm3069_vm0, %v3125_v63  ;;  %v3056_v6 = vrot.slane %v3028_v10, %v3018_v22  ;;  %v3058_v47 = vcombine.high %v3042_v40, %v3042_v40  ;;  %v3059_v50 = vcombine.high %v3049_v3, %v3049_v3 }
 0x631   :  { %3071 = vst.msk [vmem:[#allocation8 + $0x2] sm:$0x1] %vm3069_vm0, %v3049_v3  ;;  %3072 = vst.msk [vmem:[#allocation8 + $0x4] sm:$0x1] %vm3069_vm0, %v3057_v4 }
 0x632   :  { %3074 = vst.msk [vmem:[#allocation8 + $0x8] sm:$0x1] %vm3069_vm0, %v3042_v40  ;;  %3143 = vst.msk [vmem:[#allocation8 + $0xf] sm:$0x1] %vm3069_vm0, %v3127_v5  ;;  %v3060_v55 = vcombine.high %v3056_v6, %v3056_v6 }
 0x633   :  { %3073 = vst.msk [vmem:[#allocation8 + $0x6] sm:$0x1] %vm3069_vm0, %v3059_v50  ;;  %3075 = vst.msk [vmem:[#allocation8 + $0xa] sm:$0x1] %vm3069_vm0, %v3056_v6 }
 0x634   :  { %3076 = vst.msk [vmem:[#allocation8 + $0xc] sm:$0x1] %vm3069_vm0, %v3058_v47  ;;  %3077 = vst.msk [vmem:[#allocation8 + $0xe] sm:$0x1] %vm3069_vm0, %v3060_v55 }
 0x635   :  { %3635 = shalt.err (!%p3632_p5)
}
 0x636   :  { %3155 = dma.vmem_to_hbm [thread:$0]  %s3150_s27, 256, %s4253_s5, [#allocation4], %s3654_s28, %s3654_s28, %s3655_s29  }
 0x637   :  { %3648 = dma.done.wait [#allocation4], 256  }
 0x638   :  { %3649 = vsyncadd [#allocation4], 4294967040 }
 0x639   :  { %3159 = vsyncpa [#allocation3], 1 }
 0x63a   :  { %3160 = vsyncpa [#allocation6], 1 }
 0x63b   :  { %3161 = vsyncpa [#allocation4], 1 }

</bundles_post_ra>
